<compile_context>
chip_gen: v7x
topology: tpu7x:2x2x1
jax: 0.10.0
libtpu: 0.0.40
codegen_flags: <defaults>
</compile_context>

<pallas_src>
import functools

import numpy as np
import jax
import jax.numpy as jnp
from jax import lax
from jax.experimental import pallas as pl
from jax.experimental.pallas import tpu as pltpu


def _retina_decode_kernel(t_ref, cls_ref, bbox_ref, score_ref, idx_ref, *,
                          n_cls, n_w, n_hw, stride, anchor_wh, clamp_max, tn):
    # t_ref:   (1, 4,    TN)  raw bbox regressions [tx, ty, tw, th] (lane-dense)
    # cls_ref: (1, nCls, TN)  raw class logits
    j = pl.program_id(1)

    # ---- anchor grid generated in-kernel (no HBM anchor stream) ------------
    lane = lax.broadcasted_iota(jnp.int32, (1, tn), 1).astype(jnp.float32)
    n = lane + (j * tn).astype(jnp.float32)          # global flat anchor index
    # integer decomposition n -> (anchor a, row h, col w), done in f32 only
    # (no vector int div).  floor((n+0.5)/d) is exact for n < ~2e6, asserted
    # in the wrapper.
    a_i = jnp.floor((n + 0.5) * (1.0 / n_hw))
    rem = n - a_i * n_hw
    h = jnp.floor((rem + 0.5) * (1.0 / n_w))
    w = rem - h * n_w
    cx = (w + 0.5) * stride
    cy = (h + 0.5) * stride
    # per-lane anchor (aw, ah): small select chain over static anchor sizes
    aw = jnp.full_like(n, anchor_wh[0][0])
    ah = jnp.full_like(n, anchor_wh[0][1])
    for ai in range(1, len(anchor_wh)):
        sel = a_i >= (ai - 0.5)
        aw = jnp.where(sel, anchor_wh[ai][0], aw)
        ah = jnp.where(sel, anchor_wh[ai][1], ah)
    a_xy = jnp.concatenate([cx, cy], axis=0)         # (2, TN)
    a_wh = jnp.concatenate([aw, ah], axis=0)         # (2, TN)

    # ---- box decode ---------------------------------------------------------
    t = t_ref[0].astype(jnp.float32)                 # (4, TN)
    box_xy = jnp.clip(a_xy + t[0:2] * a_wh, 1.0, clamp_max)
    box_wh = jnp.clip(jnp.exp(t[2:4]) * a_wh, 1.0, clamp_max)
    bbox_ref[0, 0:2] = box_xy
    bbox_ref[0, 2:4] = box_wh

    # ---- class scores -------------------------------------------------------
    logits = cls_ref[0].astype(jnp.float32)          # (nCls, TN)
    m = jnp.max(logits, axis=0, keepdims=True)       # (1, TN)
    ridx = lax.broadcasted_iota(jnp.int32, logits.shape, 0)
    # first index attaining the max (matches torch.max tie-breaking on logits;
    # identical to argmax(sigmoid(logits)) except under sigmoid saturation ties)
    idx = jnp.min(jnp.where(logits == m, ridx, n_cls), axis=0, keepdims=True)
    # sigmoid is monotone: max(sigmoid(x)) == sigmoid(max(x)); only one row
    # through the EUP instead of nCls rows.
    score_ref[0] = jax.nn.sigmoid(m)
    idx_ref[0] = idx.astype(jnp.int32)


def retina_decode(t_xywh, cls_logits, anchor_wh, stride, img_size, tile_n=2048):
    """Pallas implementation of RetinaLayer.forward(raw, img_size, labels=None)."""
    nB, nA, nH, nW, nP = t_xywh.shape
    nCls = cls_logits.shape[-1]
    img_h, img_w = img_size
    assert nP == 4, "this kernel implements pred_bbox_format='cxcywh'"
    assert nH == int(img_h / stride) and nW == int(img_w / stride)
    N = nA * nH * nW
    assert N < (1 << 21), "float-based index decomposition needs N < ~2e6"

    # anchor sizes are model constants (computed from cfg in __init__) -> bake
    # them into the kernel instead of streaming a (4, N) anchor tensor.
    anchor_np = np.asarray(anchor_wh, dtype=np.float32)
    assert anchor_np.shape == (nA, 2)
    anchor_consts = tuple((float(x), float(y)) for x, y in anchor_np)

    # layout change to lane-dense channel-major (glue; see header comment).
    # No dtype upcast here: the kernel casts to f32 after the DMA.
    t = jnp.transpose(t_xywh.reshape(nB, N, nP), (0, 2, 1))      # (nB, 4, N)
    c = jnp.transpose(cls_logits.reshape(nB, N, nCls), (0, 2, 1))  # (nB, nCls, N)

    # pad N to a multiple of 128 so all tiles stay lane-aligned / unmasked
    N_pad = -(-N // 128) * 128
    if N_pad != N:
        t = jnp.pad(t, ((0, 0), (0, 0), (0, N_pad - N)))
        c = jnp.pad(c, ((0, 0), (0, 0), (0, N_pad - N)))

    # largest 128-multiple tile that divides N_pad, capped at tile_n
    TN = 128
    for m in range(min(tile_n, N_pad) // 128, 0, -1):
        if N_pad % (m * 128) == 0:
            TN = m * 128
            break
    # keep >= 2 grid steps so both v7x TensorCores get work
    if nB * (N_pad // TN) < 2 and TN % 256 == 0:
        TN //= 2
    grid = (nB, N_pad // TN)

    kernel = functools.partial(
        _retina_decode_kernel, n_cls=nCls, n_w=float(nW), n_hw=float(nH * nW),
        stride=float(stride), anchor_wh=anchor_consts,
        clamp_max=float(max(img_size)), tn=TN)

    bbox, score, idx = pl.pallas_call(
        kernel,
        out_shape=(jax.ShapeDtypeStruct((nB, nP, N_pad), jnp.float32),
                   jax.ShapeDtypeStruct((nB, 1, N_pad), jnp.float32),
                   jax.ShapeDtypeStruct((nB, 1, N_pad), jnp.int32)),
        grid_spec=pltpu.PrefetchScalarGridSpec(
            num_scalar_prefetch=0,
            grid=grid,
            in_specs=[pl.BlockSpec((1, nP, TN), lambda b, j: (b, 0, j)),
                      pl.BlockSpec((1, nCls, TN), lambda b, j: (b, 0, j))],
            out_specs=[pl.BlockSpec((1, nP, TN), lambda b, j: (b, 0, j)),
                       pl.BlockSpec((1, 1, TN), lambda b, j: (b, 0, j)),
                       pl.BlockSpec((1, 1, TN), lambda b, j: (b, 0, j))]),
        compiler_params=pltpu.CompilerParams(
            dimension_semantics=("parallel", "parallel")),
    )(t, c)

    bbox = bbox[:, :, :N]
    preds = {
        'bbox': bbox.transpose(0, 2, 1),       # (nB, nA*nH*nW, 4)
        'class_idx': idx[:, 0, :N],            # (nB, nA*nH*nW)
        'score': score[:, 0, :N],              # (nB, nA*nH*nW)
    }
    return preds, None


def _reference(t_xywh, cls_logits, anchor_wh, stride, img_size):
    """Pure-JAX replica of the PyTorch forward (labels=None) for verification."""
    nB, nA, nH, nW, _ = t_xywh.shape
    img_h, img_w = img_size
    a_cx = jnp.arange(stride / 2, img_w, stride).reshape(1, 1, 1, nW)
    a_cy = jnp.arange(stride / 2, img_h, stride).reshape(1, 1, nH, 1)
    a_wh = anchor_wh.reshape(1, nA, 1, 1, 2)
    px = a_cx + t_xywh[..., 0] * a_wh[..., 0]
    py = a_cy + t_xywh[..., 1] * a_wh[..., 1]
    pwh = jnp.exp(t_xywh[..., 2:4]) * a_wh
    box = jnp.concatenate([px[..., None], py[..., None], pwh], axis=-1)
    box = jnp.clip(box, 1.0, float(max(img_size)))
    p = jax.nn.sigmoid(cls_logits)
    score = p.max(-1)
    idx = p.argmax(-1)
    return (box.reshape(nB, -1, 4), idx.reshape(nB, -1).astype(jnp.int32),
            score.reshape(nB, -1))


if __name__ == "__main__":
    key = jax.random.PRNGKey(0)

    # ---- deterministic "config" (RetinaLayer.__init__ equivalents) ----
    stride = 8                         # cfg['model.fpn.out_strides'][level_i]
    anchor_base = 4                    # cfg['model.retina.anchor.base']
    scales = [1.0, 1.2599]             # cfg['model.retina.anchor.scales']
    ratios = [(1.0, 1.0), (0.7, 1.4)]  # cfg['model.retina.anchor.ratios']
    nCls = 8                           # cfg['general.num_class']
    nP = 4                             # cfg['general.bbox_param'] ('cxcywh')

    base_size = anchor_base * stride
    anchors = [(base_size * sc * rt[0], base_size * sc * rt[1])
               for sc in scales for rt in ratios]
    anchor_wh = jnp.array(anchors, dtype=jnp.float32)   # (nA, 2)
    nA = anchor_wh.shape[0]

    img_size = (128, 128)
    nB = 2
    nH, nW = img_size[0] // stride, img_size[1] // stride   # 16 x 16 -> N = 1024

    k1, k2 = jax.random.split(key)
    t_xywh = jax.random.normal(k1, (nB, nA, nH, nW, nP), jnp.float32) * 0.5
    cls_logits = jax.random.normal(k2, (nB, nA, nH, nW, nCls), jnp.float32)

    preds, loss = retina_decode(t_xywh, cls_logits, anchor_wh, stride, img_size)
    jax.block_until_ready(preds)

    ref_box, ref_idx, ref_score = _reference(t_xywh, cls_logits, anchor_wh,
                                             stride, img_size)
    assert jnp.allclose(preds['bbox'], ref_box, rtol=1e-5, atol=1e-4)
    assert jnp.allclose(preds['score'], ref_score, rtol=1e-5, atol=1e-6)
    assert bool(jnp.all(preds['class_idx'] == ref_idx))
    assert loss is None

    print("KERNEL_OK")
</pallas_src>

<mosaic_0001>
module attributes {stable_mosaic.version = 11 : i64} {
  func.func @_retina_decode_kernel(%arg0: i32, %arg1: i32, %arg2: memref<1x4x1024xf32, #tpu.memory_space<vmem>>, %arg3: memref<1x8x1024xf32, #tpu.memory_space<vmem>>, %arg4: memref<1x4x1024xf32, #tpu.memory_space<vmem>>, %arg5: memref<1x1x1024xf32, #tpu.memory_space<vmem>>, %arg6: memref<1x1x1024xi32, #tpu.memory_space<vmem>>) attributes {dimension_semantics = [#tpu.dimension_semantics<parallel>, #tpu.dimension_semantics<parallel>], iteration_bounds = array<i64: 2, 1>, scalar_prefetch = 0 : i64, scratch_operands = 0 : i64, tpu.core_type = #tpu.core_type<tc>, window_params = [{transform_indices = @transform_0, window_bounds = array<i64: 1, 4, 1024>}, {transform_indices = @transform_1, window_bounds = array<i64: 1, 8, 1024>}, {transform_indices = @transform_2, window_bounds = array<i64: 1, 4, 1024>}, {transform_indices = @transform_3, window_bounds = array<i64: 1, 1, 1024>}, {transform_indices = @transform_4, window_bounds = array<i64: 1, 1, 1024>}]} {
    %0 = tpu.iota {dimensions = array<i32: 1>} : vector<1x1024xi32>
    %1 = arith.sitofp %0 : vector<1x1024xi32> to vector<1x1024xf32>
    %c1024_i32 = arith.constant 1024 : i32
    %2 = arith.muli %arg1, %c1024_i32 : i32
    %3 = arith.sitofp %2 : i32 to f32
    %4 = vector.broadcast %3 : f32 to vector<1x1024xf32>
    %5 = arith.addf %1, %4 : vector<1x1024xf32>
    %cst = arith.constant 5.000000e-01 : f32
    %6 = vector.broadcast %cst : f32 to vector<1x1024xf32>
    %7 = arith.addf %5, %6 : vector<1x1024xf32>
    %cst_0 = arith.constant 3.906250e-03 : f32
    %8 = vector.broadcast %cst_0 : f32 to vector<1x1024xf32>
    %9 = arith.mulf %7, %8 : vector<1x1024xf32>
    %10 = math.floor %9 : vector<1x1024xf32>
    %cst_1 = arith.constant 2.560000e+02 : f32
    %11 = vector.broadcast %cst_1 : f32 to vector<1x1024xf32>
    %12 = arith.mulf %10, %11 : vector<1x1024xf32>
    %13 = arith.subf %5, %12 : vector<1x1024xf32>
    %cst_2 = arith.constant 5.000000e-01 : f32
    %14 = vector.broadcast %cst_2 : f32 to vector<1x1024xf32>
    %15 = arith.addf %13, %14 : vector<1x1024xf32>
    %cst_3 = arith.constant 6.250000e-02 : f32
    %16 = vector.broadcast %cst_3 : f32 to vector<1x1024xf32>
    %17 = arith.mulf %15, %16 : vector<1x1024xf32>
    %18 = math.floor %17 : vector<1x1024xf32>
    %cst_4 = arith.constant 1.600000e+01 : f32
    %19 = vector.broadcast %cst_4 : f32 to vector<1x1024xf32>
    %20 = arith.mulf %18, %19 : vector<1x1024xf32>
    %21 = arith.subf %13, %20 : vector<1x1024xf32>
    %cst_5 = arith.constant 5.000000e-01 : f32
    %22 = vector.broadcast %cst_5 : f32 to vector<1x1024xf32>
    %23 = arith.addf %21, %22 : vector<1x1024xf32>
    %cst_6 = arith.constant 8.000000e+00 : f32
    %24 = vector.broadcast %cst_6 : f32 to vector<1x1024xf32>
    %25 = arith.mulf %23, %24 : vector<1x1024xf32>
    %cst_7 = arith.constant 5.000000e-01 : f32
    %26 = vector.broadcast %cst_7 : f32 to vector<1x1024xf32>
    %27 = arith.addf %18, %26 : vector<1x1024xf32>
    %cst_8 = arith.constant 8.000000e+00 : f32
    %28 = vector.broadcast %cst_8 : f32 to vector<1x1024xf32>
    %29 = arith.mulf %27, %28 : vector<1x1024xf32>
    %cst_9 = arith.constant 3.200000e+01 : f32
    %30 = vector.broadcast %cst_9 : f32 to vector<1x1024xf32>
    %cst_10 = arith.constant 3.200000e+01 : f32
    %31 = vector.broadcast %cst_10 : f32 to vector<1x1024xf32>
    %cst_11 = arith.constant 5.000000e-01 : f32
    %32 = vector.broadcast %cst_11 : f32 to vector<1x1024xf32>
    %33 = arith.cmpf oge, %10, %32 : vector<1x1024xf32>
    %cst_12 = arith.constant 2.240000e+01 : f32
    %34 = vector.broadcast %cst_12 : f32 to vector<1x1024xf32>
    %35 = arith.select %33, %34, %30 : vector<1x1024xi1>, vector<1x1024xf32>
    %cst_13 = arith.constant 4.480000e+01 : f32
    %36 = vector.broadcast %cst_13 : f32 to vector<1x1024xf32>
    %37 = arith.select %33, %36, %31 : vector<1x1024xi1>, vector<1x1024xf32>
    %cst_14 = arith.constant 1.500000e+00 : f32
    %38 = vector.broadcast %cst_14 : f32 to vector<1x1024xf32>
    %39 = arith.cmpf oge, %10, %38 : vector<1x1024xf32>
    %cst_15 = arith.constant 4.031680e+01 : f32
    %40 = vector.broadcast %cst_15 : f32 to vector<1x1024xf32>
    %41 = arith.select %39, %40, %35 : vector<1x1024xi1>, vector<1x1024xf32>
    %cst_16 = arith.constant 4.031680e+01 : f32
    %42 = vector.broadcast %cst_16 : f32 to vector<1x1024xf32>
    %43 = arith.select %39, %42, %37 : vector<1x1024xi1>, vector<1x1024xf32>
    %cst_17 = arith.constant 2.500000e+00 : f32
    %44 = vector.broadcast %cst_17 : f32 to vector<1x1024xf32>
    %45 = arith.cmpf oge, %10, %44 : vector<1x1024xf32>
    %cst_18 = arith.constant 28.2217598 : f32
    %46 = vector.broadcast %cst_18 : f32 to vector<1x1024xf32>
    %47 = arith.select %45, %46, %41 : vector<1x1024xi1>, vector<1x1024xf32>
    %cst_19 = arith.constant 56.4435196 : f32
    %48 = vector.broadcast %cst_19 : f32 to vector<1x1024xf32>
    %49 = arith.select %45, %48, %43 : vector<1x1024xi1>, vector<1x1024xf32>
    %50 = tpu.concatenate %25, %29 in 0 : vector<1x1024xf32>, vector<1x1024xf32> -> vector<2x1024xf32>
    %51 = tpu.concatenate %47, %49 in 0 : vector<1x1024xf32>, vector<1x1024xf32> -> vector<2x1024xf32>
    %c0 = arith.constant 0 : index
    %c0_20 = arith.constant 0 : index
    %c0_21 = arith.constant 0 : index
    %52 = vector.load %arg2[%c0, %c0_20, %c0_21] : memref<1x4x1024xf32, #tpu.memory_space<vmem>>, vector<1x4x1024xf32>
    %53 = vector.shape_cast %52 : vector<1x4x1024xf32> to vector<4x1024xf32>
    %54 = vector.extract_strided_slice %53 {offsets = [0, 0], sizes = [2, 1024], strides = [1, 1]} : vector<4x1024xf32> to vector<2x1024xf32>
    %55 = arith.mulf %54, %51 : vector<2x1024xf32>
    %56 = arith.addf %50, %55 : vector<2x1024xf32>
    %cst_22 = arith.constant 1.000000e+00 : f32
    %cst_23 = arith.constant 1.280000e+02 : f32
    %57 = vector.broadcast %cst_22 : f32 to vector<2x1024xf32>
    %58 = arith.maximumf %57, %56 : vector<2x1024xf32>
    %59 = vector.broadcast %cst_23 : f32 to vector<2x1024xf32>
    %60 = arith.minimumf %59, %58 : vector<2x1024xf32>
    %61 = vector.extract_strided_slice %53 {offsets = [2, 0], sizes = [2, 1024], strides = [1, 1]} : vector<4x1024xf32> to vector<2x1024xf32>
    %62 = math.exp %61 : vector<2x1024xf32>
    %63 = arith.mulf %62, %51 : vector<2x1024xf32>
    %cst_24 = arith.constant 1.000000e+00 : f32
    %cst_25 = arith.constant 1.280000e+02 : f32
    %64 = vector.broadcast %cst_24 : f32 to vector<2x1024xf32>
    %65 = arith.maximumf %64, %63 : vector<2x1024xf32>
    %66 = vector.broadcast %cst_25 : f32 to vector<2x1024xf32>
    %67 = arith.minimumf %66, %65 : vector<2x1024xf32>
    %c0_26 = arith.constant 0 : index
    %c0_27 = arith.constant 0 : index
    %c0_28 = arith.constant 0 : index
    %68 = vector.load %arg4[%c0_26, %c0_27, %c0_28] : memref<1x4x1024xf32, #tpu.memory_space<vmem>>, vector<1x2x1024xf32>
    %69 = vector.shape_cast %68 : vector<1x2x1024xf32> to vector<2x1024xf32>
    %70 = vector.shape_cast %60 : vector<2x1024xf32> to vector<1x2x1024xf32>
    tpu.vector_store %arg4[%c0_26, %c0_27, %c0_28], %70 {strides = array<i32>} : memref<1x4x1024xf32, #tpu.memory_space<vmem>>, vector<1x2x1024xf32>,
    %c0_29 = arith.constant 0 : index
    %c2 = arith.constant 2 : index
    %c0_30 = arith.constant 0 : index
    %71 = vector.load %arg4[%c0_29, %c2, %c0_30] : memref<1x4x1024xf32, #tpu.memory_space<vmem>>, vector<1x2x1024xf32>
    %72 = vector.shape_cast %71 : vector<1x2x1024xf32> to vector<2x1024xf32>
    %73 = vector.shape_cast %67 : vector<2x1024xf32> to vector<1x2x1024xf32>
    tpu.vector_store %arg4[%c0_29, %c2, %c0_30], %73 {strides = array<i32>} : memref<1x4x1024xf32, #tpu.memory_space<vmem>>, vector<1x2x1024xf32>,
    %c0_31 = arith.constant 0 : index
    %c0_32 = arith.constant 0 : index
    %c0_33 = arith.constant 0 : index
    %74 = vector.load %arg3[%c0_31, %c0_32, %c0_33] : memref<1x8x1024xf32, #tpu.memory_space<vmem>>, vector<1x8x1024xf32>
    %75 = vector.shape_cast %74 : vector<1x8x1024xf32> to vector<8x1024xf32>
    %cst_34 = arith.constant dense<0xFF800000> : vector<1024xf32>
    %76 = vector.multi_reduction <maximumf>, %75, %cst_34 [0] : vector<8x1024xf32> to vector<1024xf32>
    %77 = vector.shape_cast %76 : vector<1024xf32> to vector<1x1024xf32>
    %78 = tpu.iota {dimensions = array<i32: 0>} : vector<8x1024xi32>
    %79 = vector.broadcast %77 : vector<1x1024xf32> to vector<8x1024xf32>
    %80 = arith.cmpf oeq, %75, %79 : vector<8x1024xf32>
    %c8_i32 = arith.constant 8 : i32
    %81 = vector.broadcast %c8_i32 : i32 to vector<8x1024xi32>
    %82 = arith.select %80, %78, %81 : vector<8x1024xi1>, vector<8x1024xi32>
    %cst_35 = arith.constant dense<2147483647> : vector<1024xi32>
    %83 = vector.multi_reduction <minsi>, %82, %cst_35 [0] : vector<8x1024xi32> to vector<1024xi32>
    %84 = vector.shape_cast %83 : vector<1024xi32> to vector<1x1024xi32>
    %85 = arith.negf %77 : vector<1x1024xf32>
    %86 = math.exp %85 : vector<1x1024xf32>
    %cst_36 = arith.constant 1.000000e+00 : f32
    %87 = vector.broadcast %cst_36 : f32 to vector<1x1024xf32>
    %88 = arith.addf %87, %86 : vector<1x1024xf32>
    %89 = arith.divf %87, %88 : vector<1x1024xf32>
    %c0_37 = arith.constant 0 : index
    %c0_38 = arith.constant 0 : index
    %c0_39 = arith.constant 0 : index
    %90 = vector.load %arg5[%c0_37, %c0_38, %c0_39] : memref<1x1x1024xf32, #tpu.memory_space<vmem>>, vector<1x1x1024xf32>
    %91 = vector.shape_cast %90 : vector<1x1x1024xf32> to vector<1x1024xf32>
    %92 = vector.shape_cast %89 : vector<1x1024xf32> to vector<1x1x1024xf32>
    tpu.vector_store %arg5[%c0_37, %c0_38, %c0_39], %92 {strides = array<i32>} : memref<1x1x1024xf32, #tpu.memory_space<vmem>>, vector<1x1x1024xf32>,
    %c0_40 = arith.constant 0 : index
    %c0_41 = arith.constant 0 : index
    %c0_42 = arith.constant 0 : index
    %93 = vector.load %arg6[%c0_40, %c0_41, %c0_42] : memref<1x1x1024xi32, #tpu.memory_space<vmem>>, vector<1x1x1024xi32>
    %94 = vector.shape_cast %93 : vector<1x1x1024xi32> to vector<1x1024xi32>
    %95 = vector.shape_cast %84 : vector<1x1024xi32> to vector<1x1x1024xi32>
    tpu.vector_store %arg6[%c0_40, %c0_41, %c0_42], %95 {strides = array<i32>} : memref<1x1x1024xi32, #tpu.memory_space<vmem>>, vector<1x1x1024xi32>,
    return
  }
  func.func @transform_0(%arg0: i32, %arg1: i32) -> (i32, i32, i32) {
    %c0_i32 = arith.constant 0 : i32
    %c0_i32_0 = arith.constant 0 : i32
    return %arg0, %c0_i32, %arg1 : i32, i32, i32
  }
  func.func @transform_1(%arg0: i32, %arg1: i32) -> (i32, i32, i32) {
    %c0_i32 = arith.constant 0 : i32
    %c0_i32_0 = arith.constant 0 : i32
    return %arg0, %c0_i32, %arg1 : i32, i32, i32
  }
  func.func @transform_2(%arg0: i32, %arg1: i32) -> (i32, i32, i32) {
    %c0_i32 = arith.constant 0 : i32
    %c0_i32_0 = arith.constant 0 : i32
    return %arg0, %c0_i32, %arg1 : i32, i32, i32
  }
  func.func @transform_3(%arg0: i32, %arg1: i32) -> (i32, i32, i32) {
    %c0_i32 = arith.constant 0 : i32
    %c0_i32_0 = arith.constant 0 : i32
    return %arg0, %c0_i32, %arg1 : i32, i32, i32
  }
  func.func @transform_4(%arg0: i32, %arg1: i32) -> (i32, i32, i32) {
    %c0_i32 = arith.constant 0 : i32
    %c0_i32_0 = arith.constant 0 : i32
    return %arg0, %c0_i32, %arg1 : i32, i32, i32
  }
}

</mosaic_0001>

<bundles_post_ra>
// kernel: tpu_custom_call.1
= control target key start
LH: loop header
LB: loop body
LE: loop exit
PB: predicated region body
PF: predicated region fallthrough
CT: control target
= control target key end

     0   :  { %10 = vsyncpa [#allocation3], 0  ;;  %s2262_s0 = inlined_call_operand.hbm [shape: f32[2,4,1024], index: 0, kind: input, shape index: {}]   ;;  %s2263_s1 = inlined_call_operand.hbm [shape: f32[2,8,1024], index: 1, kind: input, shape index: {}]   ;;  %s2264_s2 = inlined_call_operand.hbm [shape: f32[2,4,1024], index: 2, kind: output, shape index: {0}]   ;;  %s2265_s3 = inlined_call_operand.hbm [shape: f32[2,1,1024], index: 3, kind: output, shape index: {1}]   ;;  %s2266_s4 = inlined_call_operand.hbm [shape: s32[2,1,1024], index: 4, kind: output, shape index: {2}]  }
   0x1   :  { %12 = vsyncpa [#allocation3 + $0x1], 0 }
   0x2   :  { %13 = vsyncpa [#allocation6], 0 }
   0x3   :  { %15 = vsyncpa [#allocation6 + $0x1], 0 }
   0x4   :  { %16 = vsyncpa [#allocation4], 0 }
   0x5   :  { %18 = vsyncpa [#allocation4 + $0x1], 0 }
   0x6   :  { %19 = vsyncpa [#allocation9], 0 }
   0x7   :  { %21 = vsyncpa [#allocation9 + $0x1], 0  ;;  %s1580_s15 = smov 0   ;;  %s1582_s16 = smov 0  }
   0x8   :  { %s1584_s17 = smov 0   ;;  %s1586_s18 = smov 0  }
   0x9   :  { %s1588_s19 = smov 0   ;;  %s1590_s20 = smov 0  }
   0xa LB: > { %s1611_s21 = sadd.s32 4294967295, %s1546_s20   ;;  %s2268_s22 = sadd.s32 4294967294, %s1546_s20   ;;  %s1546_s20 = sphi %s1590_s20, %s27_s20   ;;  %s1542_s19 = sphi %s1588_s19, %s2292_s19   ;;  %s1538_s18 = sphi %s1586_s18, %s2291_s18   ;;  %s1534_s17 = sphi %s1584_s17, %s2290_s17   ;;  %s1530_s16 = sphi %s1582_s16, %s2289_s16   ;;  %s1526_s15 = sphi %s1580_s15, %s2288_s15  }
   0xb   : > { %s39_s23 = sadd.s32 1, %s1542_s19  ;;  %s48_s24 = sadd.s32 1, %s1534_s17 }
   0xc   : > { %p41_p0 = scmp.ge.s32.totalorder %s39_s23, 2  ;;  %p55_p1 = scmp.ne.s32.totalorder %s1534_s17, %s1530_s16 }
   0xd   : > { %p56_p2 = scmp.eq.s32.totalorder %s1546_s20, 0  ;;  %p61_p3 = scmp.ne.s32.totalorder %s1530_s16, %s1526_s15 }
   0xe   : > { %s2294_s23 = smov (%p41_p0, %s39_s23), 0  ;;  %p62_p5 = scmp.eq.s32.totalorder %s1611_s21, 0 }
   0xf   : > { %p1623_p4 = por %p56_p2, %p55_p1  ;;  %s43_s26 = ssub.s32 %s1542_s19, %s2294_s23 }
  0x10   : > { %p115_p6 = scmp.eq.s32.totalorder %s1611_s21, 1  ;;  %p46_p7 = scmp.eq.s32.totalorder %s43_s26, 0 }
  0x11   : > { %p1631_p8 = por %p62_p5, %p61_p3  ;;  %p121_p10 = scmp.eq.s32.totalorder %s2268_s22, 1 }
  0x12   : > { %p1635_p9 = por %p115_p6, %p55_p1  ;;  %p1248_p13 = scmp.lt.s32.totalorder %s1546_s20, 2 }
  0x13   : > { %s2271_s27 = scalar_select %p1631_p8, 1, 0 }
  0x14   : > { %s2272_s28 = scalar_select %p1635_p9, 1, 0 }
  0x15   : > { %s1642_s29 = scalar_select %p46_p7, %s1534_s17, %s48_s24  }
  0x16   : > { %p1644_p11 = por %p121_p10, %p61_p3  ;;  %s1651_s5 = sand.u32 1, %s1534_s17  }
  0x17   : > { %s1185_s6 = sshll.u32 %s1651_s5, 5  ;;  %s1216_s7 = sshll.u32 %s1542_s19, 9 }
  0x18   : > { %s2273_s30 = scalar_select %p1644_p11, 1, 0 }
  0x19   : > { %s1658_s10 = scalar_lea.hbm %s2262_s0, %s1216_s7  ;;  %s201_s11 = scalar_lea.vmem [#allocation2], %s1185_s6 }
  0x1a   : > { %s211_s12 = sshll.u32 %s201_s11, 4  ;;  %p1664_p0 = pnand %p1248_p13, %p1623_p4  ;;  %s1660_s12 = int_to_ptr.vmem [resolvable:$true] %s211_s12 }
  0x1b   : > { %s198_s14 = scalar_lea.sflag [#allocation3], %s1651_s5  ;;  %s1340_s24 = scalar_lea.hbm %s1658_s10, 512 }
  0x1c   : > { %p1341_p3 = scmp.ne.s32.totalorder %s1658_s10, %s1340_s24  ;;  %p1342_p5 = pneg %p1664_p0 }
  0x1d   : > { %s1345_s25 = scalar_lea.hbm %s2262_s0, 1024  ;;  %p1346_p4 = scmp.lt.u32.totalorder %s1658_s10, %s2262_s0 }
  0x1e   : > { %p1343_p6 = pnand %p1342_p5, %p1341_p3  ;;  %p1347_p10 = scmp.lt.u32.totalorder %s1345_s25, %s1340_s24 }
  0x1f   : > { %p1349_p12 = scmp.lt.u32.totalorder %s1340_s24, %s1658_s10 }
  0x20   : > { %p1344_p7 = pneg %p1343_p6  ;;  %p1348_p13 = por %p1347_p10, %p1346_p4 }
  0x22   : > { %p1350_p1 = por %p1349_p12, %p1348_p13 }
  0x24   : > { %p1351_p2 = pnand %p1350_p1, %p1344_p7 }
  0x26   : > { %1354 = shalt.err (!%p1351_p2)
}
  0x27   : > { %s1355_s9 = scalar_lea.vmem %s1660_s12, 512  ;;  %s1548_s11 = smov [#allocation2]  }
  0x28   : > { %p1356_p3 = scmp.ne.s32.totalorder %s1660_s12, %s1355_s9  ;;  %s1360_s26 = sshll.u32 %s1548_s11, 4  ;;  %s1361_s26 = int_to_ptr.vmem [resolvable:$false] %s1360_s26 }
  0x29   : > { %s1362_s6 = scalar_lea.vmem %s1361_s26, 1024  ;;  %p1363_p9 = scmp.lt.s32.totalorder %s1660_s12, %s1361_s26 }
  0x2a   : > { %p1358_p6 = pnand %p1356_p3, %p1342_p5  ;;  %p1364_p4 = scmp.lt.s32.totalorder %s1362_s6, %s1355_s9 }
  0x2c   : > { %p1359_p11 = pneg %p1358_p6  ;;  %p1365_p10 = por %p1364_p4, %p1363_p9 }
  0x2e   : > { %p1366_p12 = pnand %p1365_p10, %p1359_p11 }
  0x30   : > { %1369 = shalt.err (!%p1366_p12)
}
  0x31   : > { %1234 = dma.hbm_to_vmem [thread:$0]  (!%p1664_p0), %s1658_s10, 512, %s1660_s12, %s198_s14  }
  0x32   : > { %p2275_p1 = scmp.lt.s32.totalorder %s1546_s20, 3  ;;  %p2276_p2 = scmp.ge.s32.totalorder %s1546_s20, 1 }
  0x33   : > { %s1188_s25 = sshll.u32 %s1651_s5, 6  ;;  %s1217_s7 = sshll.u32 %s1542_s19, 10 }
  0x34   : > { %p1700_p7 = pnand %p2276_p2, %p2275_p1  ;;  %s1709_s11 = scalar_lea.hbm %s2263_s1, %s1217_s7 }
  0x35   : > { %s222_s26 = scalar_lea.vmem [#allocation5], %s1188_s25  ;;  %s219_s10 = scalar_lea.sflag [#allocation6], %s1651_s5 }
  0x36   : > { %s2277_s24 = scalar_select %p1700_p7, 1, 0 }
  0x37   : > { %s232_s6 = sshll.u32 %s222_s26, 4  ;;  %s1370_s12 = scalar_lea.hbm %s1709_s11, 1024  ;;  %s233_s6 = int_to_ptr.vmem [resolvable:$true] %s232_s6 }
  0x38   : > { %p1371_p9 = scmp.ne.s32.totalorder %s1709_s11, %s1370_s12  ;;  %s1375_s8 = scalar_lea.hbm %s2263_s1, 2048 }
  0x39   : > { %p1376_p3 = scmp.lt.u32.totalorder %s1709_s11, %s2263_s1  ;;  %p1377_p6 = scmp.lt.u32.totalorder %s1375_s8, %s1370_s12 }
  0x3a   : > { %p1373_p11 = pnand %p1371_p9, %p1342_p5  ;;  %p1379_p10 = scmp.lt.u32.totalorder %s1370_s12, %s1709_s11 }
  0x3b   : > { %p1378_p4 = por %p1377_p6, %p1376_p3 }
  0x3c   : > { %p1374_p13 = pneg %p1373_p11 }
  0x3d   : > { %p1380_p12 = por %p1379_p10, %p1378_p4 }
  0x3f   : > { %p1381_p1 = pnand %p1380_p12, %p1374_p13 }
  0x41   : > { %1384 = shalt.err (!%p1381_p1)
}
  0x42   : > { %s1385_s5 = scalar_lea.vmem %s233_s6, 1024  ;;  %s1549_s25 = smov [#allocation5]  }
  0x43   : > { %p1386_p2 = scmp.ne.s32.totalorder %s233_s6, %s1385_s5  ;;  %s1390_s22 = sshll.u32 %s1549_s25, 4  ;;  %s1391_s22 = int_to_ptr.vmem [resolvable:$false] %s1390_s22 }
  0x44   : > { %s1392_s26 = scalar_lea.vmem %s1391_s22, 2048  ;;  %p1393_p8 = scmp.lt.s32.totalorder %s233_s6, %s1391_s22 }
  0x45   : > { %p1388_p9 = pnand %p1386_p2, %p1342_p5  ;;  %p1394_p7 = scmp.lt.s32.totalorder %s1392_s26, %s1385_s5 }
  0x47   : > { %p1389_p11 = pneg %p1388_p9  ;;  %p1395_p3 = por %p1394_p7, %p1393_p8 }
  0x49   : > { %p1396_p6 = pnand %p1395_p3, %p1389_p11 }
  0x4b   : > { %1399 = shalt.err (!%p1396_p6)
}
  0x4c   : > { %1237 = dma.hbm_to_vmem [thread:$0]  (!%p1664_p0), %s1709_s11, 1024, %s233_s6, %s219_s10  }
  0x4d   : > { %p2278_p13 = scmp.ne.s32.totalorder %s2277_s24, 0 }
  0x4e   : > { %s1734_s12 = sand.u32 (!%p2278_p13), 1, %s1530_s16   ;;  %p2279_p8 = scmp.ne.s32.totalorder (!%p2278_p13), %s2271_s27, 0 }
  0x4f   : > { %241 = sbr.rel (%p2278_p13) target bundleno = 269 (0x10d), region = 28  ;;  %s1192_s14 = sshll.u32 (!%p2278_p13), %s1734_s12, 5 }
  0x50   : > { %s244_s8 = scalar_lea.sflag (!%p2278_p13), [#allocation3], %s1734_s12  ;;  %s1740_s7 = scalar_lea.vmem (!%p2278_p13), [#allocation2], %s1192_s14 }
  0x56   : > { %1509 = dma.done.wait (%p2279_p8), %s244_s8, 512  }
  0x57   : > { %1511 = vsyncadd (%p2279_p8), %s244_s8, 4294966784  ;;  %s1193_s13 = sshll.u32 %s1734_s12, 6  ;;  %s253_s24 = scalar_lea.sflag [#allocation6], %s1734_s12 }
  0x58   : > { %s1748_s11 = scalar_lea.vmem [#allocation5], %s1193_s13 }
  0x59   : > { %1513 = dma.done.wait (%p2279_p8), %s253_s24, 1024  }
  0x5a   : > { %1515 = vsyncadd (%p2279_p8), %s253_s24, 4294966272  ;;  %v301_v0 = vlaneseq  ;;  %v1550_v1 = vmov 1966171168   ;;  %v1787_v17 = vld [vmem:[%s1748_s11] sm:$0xff]  ;;  %v1790_v18 = vld [vmem:[%s1748_s11 + $0x8] sm:$0xff]  ;;  %vm513_vm0 = vcmask 1040384  }
  0x5b   : > { %v849_v2 = vunpack.c.l.s4 %v1550_v1  ;;  %v1793_v19 = vld [vmem:[%s1748_s11 + $0x10] sm:$0xff]  ;;  %v1802_v24 = vld [vmem:[%s1748_s11 + $0x18] sm:$0xff]  ;;  %v1805_v25 = vld [vmem:[%s1748_s11 + $0x20] sm:$0xff]  ;;  %v650_v27 = vrot.slane %v1787_v17, 4  ;;  %v656_v28 = vrot.slane %v1790_v18, 4  ;;  %s1195_s27 = sshll.u32 %s1734_s12, 3 }
  0x5c   : > { %v1754_v3 = vand.u32 127, %v301_v0  ;;  %v1756_v4 = vshrl.u32 %v301_v0, 7  ;;  %v1808_v26 = vld [vmem:[%s1748_s11 + $0x28] sm:$0xff]  ;;  %v662_v29 = vrot.slane %v1793_v19, 4  ;;  %v1815_v31 = vld [vmem:[%s1748_s11 + $0x30] sm:$0xff]  ;;  %v1818_v32 = vld [vmem:[%s1748_s11 + $0x38] sm:$0xff] }
  0x5d   : > { %v850_v5 = vunpack.c.0.s8 %v849_v2  ;;  %v668_v33 = vrot.slane %v1802_v24, 4  ;;  %v674_v34 = vrot.slane %v1805_v25, 4  ;;  %v680_v35 = vrot.slane %v1808_v26, 4  ;;  %s1946_s6 = scalar_lea.vmem [#allocation7], %s1192_s14  ;;  %s288_s10 = scalar_lea.vmem [#allocation8], %s1195_s27 }
  0x5e   : > { %v1759_v6 = vadd.s32 128, %v1754_v3  ;;  %v310_v7 = vcvt.s32.f32 %v1754_v3  ;;  %v1763_v8 = vadd.s32 256, %v1754_v3  ;;  %v1766_v9 = vadd.s32 384, %v1754_v3  ;;  %s988_s9 = sshll.u32 %s288_s10, 4  ;;  %s950_s5 = sand.u32 1, %s1611_s21   ;;  %s1979_s9 = int_to_ptr.vmem [resolvable:$true] %s988_s9 }
  0x5f   : > { %v1769_v10 = vadd.s32 512, %v1754_v3  ;;  %v1772_v11 = vadd.s32 640, %v1754_v3  ;;  %v1775_v12 = vadd.s32 768, %v1754_v3  ;;  %v1778_v13 = vsub.s32 %v850_v5, %v1756_v4  ;;  %s1219_s25 = sshll.u32 %s1538_s18, 7  ;;  %s2011_s14 = scalar_lea.sflag [#allocation9], %s950_s5 }
  0x60   : > { %v311_v14 = vcvt.s32.f32 %v1759_v6  ;;  %v1783_v15 = vadd.f32 0.5, %v310_v7  ;;  %v312_v16 = vcvt.s32.f32 %v1763_v8  ;;  %v313_v20 = vcvt.s32.f32 %v1766_v9  ;;  %s1995_s26 = scalar_lea.hbm %s2265_s3, %s1219_s25  ;;  %s1400_s8 = scalar_lea.vmem %s1979_s9, 128 }
  0x61   : > { %v314_v21 = vcvt.s32.f32 %v1769_v10  ;;  %v315_v22 = vcvt.s32.f32 %v1772_v11  ;;  %v1799_v23 = vadd.s32 896, %v1754_v3  ;;  %v316_v30 = vcvt.s32.f32 %v1775_v12  ;;  %p1401_p0 = scmp.ne.s32.totalorder %s1979_s9, %s1400_s8  ;;  %p2280_p5 = scmp.ne.s32.totalorder %s2272_s28, 0 }
  0x62   : > { %v330_v36 = vadd.f32 0.5, %v311_v14  ;;  %v651_v37 = vmax.f32 %v1787_v17, %v650_v27  ;;  %v657_v38 = vmax.f32 %v1790_v18, %v656_v28  ;;  %v663_v39 = vmax.f32 %v1793_v19, %v662_v29  ;;  %s1552_s13 = smov [#allocation8]  }
  0x63   : > { %v686_v40 = vrot.slane %v1815_v31, 4  ;;  %v669_v41 = vmax.f32 %v1802_v24, %v668_v33  ;;  %v675_v42 = vmax.f32 %v1805_v25, %v674_v34  ;;  %v681_v43 = vmax.f32 %v1808_v26, %v680_v35  ;;  %p1402_p7 = pnand %p1401_p0, %p2280_p5  ;;  %s1404_s24 = sshll.u32 %s1552_s13, 4  ;;  %s1405_s24 = int_to_ptr.vmem [resolvable:$false] %s1404_s24 }
  0x64   : > { %v692_v44 = vrot.slane %v1818_v32, 4  ;;  %v652_v45 = vrot.slane %v651_v37, 2  ;;  %v658_v46 = vrot.slane %v657_v38, 2  ;;  %v664_v47 = vrot.slane %v663_v39, 2  ;;  %s1406_s11 = scalar_lea.vmem %s1405_s24, 256  ;;  %p1407_p10 = scmp.lt.s32.totalorder %s1979_s9, %s1405_s24 }
  0x65   : > { %v687_v48 = vmax.f32 %v1815_v31, %v686_v40  ;;  %v670_v49 = vrot.slane %v669_v41, 2  ;;  %v676_v50 = vrot.slane %v675_v42, 2  ;;  %v682_v51 = vrot.slane %v681_v43, 2  ;;  %v1848_v40 = vld [vmem:[%s1740_s7] sm:$0xff]  ;;  %p1403_p4 = pneg %p1402_p7  ;;  %p1408_p12 = scmp.lt.s32.totalorder %s1406_s11, %s1400_s8 }
  0x66   : > { %v693_v52 = vmax.f32 %v1818_v32, %v692_v44  ;;  %v653_v53 = vmax.f32 %v651_v37, %v652_v45  ;;  %v659_v54 = vmax.f32 %v657_v38, %v658_v46  ;;  %v665_v55 = vmax.f32 %v663_v39, %v664_v47 }
  0x67   : > { %v688_v56 = vrot.slane %v687_v48, 2  ;;  %v671_v57 = vmax.f32 %v669_v41, %v670_v49  ;;  %v677_v58 = vmax.f32 %v675_v42, %v676_v50  ;;  %v683_v59 = vmax.f32 %v681_v43, %v682_v51  ;;  %p1409_p1 = por %p1408_p12, %p1407_p10 }
  0x68   : > { %v694_v60 = vrot.slane %v693_v52, 2  ;;  %v654_v61 = vrot.slane %v653_v53, 1  ;;  %v660_v62 = vrot.slane %v659_v54, 1  ;;  %v666_v63 = vrot.slane %v665_v55, 1 }
  0x69   : > { %v689_v0 = vmax.f32 %v687_v48, %v688_v56  ;;  %v672_v1 = vrot.slane %v671_v57, 1  ;;  %v678_v2 = vrot.slane %v677_v58, 1  ;;  %v684_v5 = vrot.slane %v683_v59, 1  ;;  %p1410_p2 = pnand %p1409_p1, %p1403_p4 }
  0x6a   : > { %v695_v27 = vmax.f32 %v693_v52, %v694_v60  ;;  %v1835_v28 = vmax.f32 %v653_v53, %v654_v61  ;;  %v1837_v29 = vmax.f32 %v659_v54, %v660_v62  ;;  %v1839_v33 = vmax.f32 %v665_v55, %v666_v63  ;;  %v1863_v52 = vld [vmem:[%s1740_s7 + $0x8] sm:$0xff] }
  0x6b   : > { %v690_v34 = vrot.slane %v689_v0, 1  ;;  %v1841_v35 = vmax.f32 %v671_v57, %v672_v1  ;;  %v1843_v37 = vmax.f32 %v677_v58, %v678_v2  ;;  %v1845_v38 = vmax.f32 %v683_v59, %v684_v5 }
  0x6c   : > { %v696_v39 = vrot.slane %v695_v27, 1  ;;  %v1197_v42 = vmul.f32 -1.442695, %v1835_v28  ;;  %v1198_v43 = vmul.f32 -1.442695, %v1837_v29  ;;  %v337_v50 = vmul.f32 0.00390625, %v1783_v15 }
  0x6d   : > { %v1850_v41 = vmax.f32 %v689_v0, %v690_v34  ;;  %v1199_v44 = vmul.f32 -1.442695, %v1839_v33  ;;  %v1200_v46 = vmul.f32 -1.442695, %v1841_v35  ;;  %v1201_v47 = vmul.f32 -1.442695, %v1843_v37 }
  0x6e   : > { %v1855_v45 = vmax.f32 %v695_v27, %v696_v39  ;;  %v1202_v48 = vmul.f32 -1.442695, %v1845_v38  ;;  %1300 = vpow2.f32 %v1197_v42  ;;  %v338_v51 = vmul.f32 0.00390625, %v330_v36 }
  0x6f   : > { %v1203_v49 = vmul.f32 -1.442695, %v1850_v41  ;;  %1302 = vpow2.f32 %v1198_v43  ;;  %v590_v54 = vmul.f32 1.442695, %v1848_v40  ;;  %v331_v55 = vadd.f32 0.5, %v312_v16 }
  0x70   : > { %v1204_v53 = vmul.f32 -1.442695, %v1855_v45  ;;  %1304 = vpow2.f32 %v1199_v44  ;;  %v345_v56 = vfloor.f32 %v337_v50  ;;  %v346_v57 = vfloor.f32 %v338_v51 }
  0x71   : > { %v332_v58 = vadd.f32 0.5, %v313_v20  ;;  %1306 = vpow2.f32 %v1200_v46  ;;  %v1871_v15 = vmul.f32 0.00390625, %v331_v55  ;;  %v1874_v36 = vmul.f32 1.442695, %v1863_v52 }
  0x72   : > { %v1878_v59 = vadd.f32 0.5, %v314_v21  ;;  %1308 = vpow2.f32 %v1201_v47  ;;  %v353_v60 = vmul.f32 256.0, %v345_v56  ;;  %v354_v61 = vmul.f32 256.0, %v346_v57 }
  0x73   : > { %vm441_vm1 = vcmp.ge.f32.partialorder %v345_v56, 0.5  ;;  %1310 = vpow2.f32 %v1202_v48  ;;  %vm442_vm2 = vcmp.ge.f32.partialorder %v346_v57, 0.5  ;;  %v1551_v62 = vmov 32.0  }
  0x74   : > { %v449_v63 = vsel %vm441_vm1, 22.4, %v1551_v62  ;;  %v457_v0 = vsel %vm441_vm1, 44.8, %v1551_v62  ;;  %1312 = vpow2.f32 %v1203_v49  ;;  %v361_v1 = vsub.f32 %v310_v7, %v353_v60 }
  0x75   : > { %v362_v2 = vsub.f32 %v311_v14, %v354_v61  ;;  %v450_v5 = vsel %vm442_vm2, 22.4, %v1551_v62  ;;  %1314 = vpow2.f32 %v1204_v53  ;;  %v458_v27 = vsel %vm442_vm2, 44.8, %v1551_v62 }
  0x76   : > { %vm465_vm3 = vcmp.ge.f32.partialorder %v345_v56, 1.5  ;;  %vm466_vm4 = vcmp.ge.f32.partialorder %v346_v57, 1.5  ;;  %v369_v34 = vadd.f32 0.5, %v361_v1  ;;  %vm489_vm5 = vcmp.ge.f32.partialorder %v345_v56, 2.5 }
  0x77   : > { %v370_v39 = vadd.f32 0.5, %v362_v2  ;;  %v473_v42 = vsel %vm465_vm3, 40.3168, %v449_v63  ;;  %v474_v43 = vsel %vm466_vm4, 40.3168, %v450_v5  ;;  %vm490_vm6 = vcmp.ge.f32.partialorder %v346_v57, 2.5 }
  0x78   : > { %v481_v44 = vsel %vm465_vm3, 40.3168, %v457_v0  ;;  %v482_v46 = vsel %vm466_vm4, 40.3168, %v458_v27  ;;  %v1301_v3 = vpop.eup %1300  ;;  %v377_v7 = vmul.f32 0.0625, %v369_v34  ;;  %1316 = vpow2.f32 %v590_v54 }
  0x79   : > { %v378_v47 = vmul.f32 0.0625, %v370_v39  ;;  %v497_v6 = vsel %vm489_vm5, 28.22176, %v473_v42  ;;  %v498_v14 = vsel %vm490_vm6, 28.22176, %v474_v43  ;;  %v1303_v48 = vpop.eup %1302  ;;  %v812_v49 = vadd.f32 1.0, %v1301_v3 }
  0x7a   : > { %v505_v50 = vsel %vm489_vm5, 56.44352, %v481_v44  ;;  %v506_v51 = vsel %vm490_vm6, 56.44352, %v482_v46  ;;  %v1305_v53 = vpop.eup %1304  ;;  %v813_v55 = vadd.f32 1.0, %v1303_v48  ;;  %v385_v60 = vfloor.f32 %v377_v7 }
  0x7b   : > { %v386_v61 = vfloor.f32 %v378_v47  ;;  %v522_v63 = vsel %vm513_vm0, %v497_v6, %v505_v50  ;;  %v1307_v0 = vpop.eup %1306  ;;  %v814_v5 = vadd.f32 1.0, %v1305_v53  ;;  %1318 = vrcp.f32 %v812_v49 }
  0x7c   : > { %v523_v56 = vsel %vm513_vm0, %v498_v14, %v506_v51  ;;  %v340_v57 = vmul.f32 0.00390625, %v332_v58  ;;  %v1309_v27 = vpop.eup %1308  ;;  %v815_v34 = vadd.f32 1.0, %v1307_v0  ;;  %1320 = vrcp.f32 %v813_v55 }
  0x7d   : > { %v393_v39 = vmul.f32 16.0, %v385_v60  ;;  %v394_v42 = vmul.f32 16.0, %v386_v61  ;;  %v1311_v43 = vpop.eup %1310  ;;  %v816_v44 = vadd.f32 1.0, %v1309_v27  ;;  %1322 = vrcp.f32 %v814_v5 }
  0x7e   : > { %v425_v54 = vadd.f32 0.5, %v385_v60  ;;  %v426_v46 = vadd.f32 0.5, %v386_v61  ;;  %v1313_v3 = vpop.eup %1312  ;;  %v817_v7 = vadd.f32 1.0, %v1311_v43  ;;  %1324 = vrcp.f32 %v815_v34 }
  0x7f   : > { %v401_v47 = vsub.f32 %v361_v1, %v393_v39  ;;  %v402_v6 = vsub.f32 %v362_v2, %v394_v42  ;;  %v1315_v48 = vpop.eup %1314  ;;  %v818_v49 = vadd.f32 1.0, %v1313_v3  ;;  %1326 = vrcp.f32 %v816_v44 }
  0x80   : > { %v433_v14 = vmul.f32 8.0, %v425_v54  ;;  %v434_v58 = vmul.f32 8.0, %v426_v46  ;;  %v819_v50 = vadd.f32 1.0, %v1315_v48  ;;  %1328 = vrcp.f32 %v817_v7 }
  0x81   : > { %v409_v51 = vadd.f32 0.5, %v401_v47  ;;  %v410_v53 = vadd.f32 0.5, %v402_v6  ;;  %1330 = vrcp.f32 %v818_v49  ;;  %v1890_v55 = vcombine.low %v522_v63, %v523_v56 }
  0x82   : > { %v1893_v60 = vfloor.f32 %v1871_v15  ;;  %v1895_v61 = vfloor.f32 %v340_v57  ;;  %1332 = vrcp.f32 %v819_v50  ;;  %v1899_v0 = vadd.f32 0.5, %v315_v22  ;;  %v1901_v5 = vpop.eup %1316 }
  0x83   : > { %v417_v1 = vmul.f32 8.0, %v409_v51  ;;  %v418_v2 = vmul.f32 8.0, %v410_v53  ;;  %v550_v27 = vmul.f32 %v1890_v55, %v1848_v40  ;;  %1334 = vpow2.f32 %v1874_v36 }
  0x84   : > { %v355_v63 = vmul.f32 256.0, %v1893_v60  ;;  %v356_v56 = vmul.f32 256.0, %v1895_v61  ;;  %vm443_vm7 = vcmp.ge.f32.partialorder %v1893_v60, 0.5  ;;  %vm444_vm8 = vcmp.ge.f32.partialorder %v1895_v61, 0.5 }
  0x85   : > { %v514_v15 = vsel %vm513_vm0, %v417_v1, %v433_v14  ;;  %v515_v57 = vsel %vm513_vm0, %v418_v2, %v434_v58  ;;  %v451_v34 = vsel %vm443_vm7, 22.4, %v1551_v62  ;;  %v1319_v39 = vpop.eup %1318  ;;  %v558_v42 = vcombine.high %v550_v27, %v550_v27 }
  0x86   : > { %v566_v43 = vadd.f32 %v550_v27, %v514_v15  ;;  %v1914_v40 = vsub.f32 %v312_v16, %v355_v63  ;;  %v1918_v44 = vsub.f32 %v313_v20, %v356_v56  ;;  %v1321_v54 = vpop.eup %1320  ;;  %v452_v46 = vsel %vm444_vm8, 22.4, %v1551_v62 }
  0x87   : > { %v459_v3 = vsel %vm443_vm7, 44.8, %v1551_v62  ;;  %v460_v7 = vsel %vm444_vm8, 44.8, %v1551_v62  ;;  %v1323_v47 = vpop.eup %1322  ;;  %v844_v6 = vcombine.low %v1319_v39, %v1321_v54  ;;  %v567_v48 = vadd.f32 %v558_v42, %v515_v57 }
  0x88   : > { %v574_v49 = vmax.f32 %v566_v43, 1.0  ;;  %v371_v8 = vadd.f32 0.5, %v1914_v40  ;;  %v1325_v16 = vpop.eup %1324  ;;  %v372_v9 = vadd.f32 0.5, %v1918_v44  ;;  %vm467_vm9 = vcmp.ge.f32.partialorder %v1893_v60, 1.5 }
  0x89   : > { %vm468_vm10 = vcmp.ge.f32.partialorder %v1895_v61, 1.5  ;;  %vm491_vm11 = vcmp.ge.f32.partialorder %v1893_v60, 2.5  ;;  %v1327_v20 = vpop.eup %1326  ;;  %v845_v14 = vcombine.low %v1323_v47, %v1325_v16  ;;  %v854_v36 = vrot.slane %v844_v6, %v1778_v13 }
  0x8a   : > { %v575_v58 = vmax.f32 %v567_v48, 1.0  ;;  %v582_v50 = vmin.f32 %v574_v49, 128.0  ;;  %v1329_v51 = vpop.eup %1328  ;;  %v379_v53 = vmul.f32 0.0625, %v371_v8  ;;  %v380_v1 = vmul.f32 0.0625, %v372_v9 }
  0x8b   : > { %v475_v2 = vsel %vm467_vm9, 40.3168, %v451_v34  ;;  %v476_v27 = vsel %vm468_vm10, 40.3168, %v452_v46  ;;  %v1331_v63 = vpop.eup %1330  ;;  %v846_v56 = vcombine.low %v1327_v20, %v1329_v51  ;;  %v861_v15 = vrot.slane %v845_v14, %v1778_v13 }
  0x8c   : > { %v583_v57 = vmin.f32 %v575_v58, 128.0  ;;  %v483_v39 = vsel %vm467_vm9, 40.3168, %v459_v3  ;;  %v1333_v42 = vpop.eup %1332  ;;  %v387_v43 = vfloor.f32 %v379_v53  ;;  %v388_v54 = vfloor.f32 %v380_v1 }
  0x8d   : > { %v484_v47 = vsel %vm468_vm10, 40.3168, %v460_v7  ;;  %vm492_vm12 = vcmp.ge.f32.partialorder %v1895_v61, 2.5  ;;  %v847_v34 = vcombine.low %v1331_v63, %v1333_v42  ;;  %v868_v46 = vrot.slane %v846_v56, %v1778_v13 }
  0x8e   : > { %v876_v6 = vcombine.low %v854_v36, %v861_v15  ;;  %v626_v48 = vcombine.low %v582_v50, %v583_v57  ;;  %v395_v49 = vmul.f32 16.0, %v387_v43  ;;  %v396_v8 = vmul.f32 16.0, %v388_v54  ;;  %v1953_v36 = vpop.eup %1334 }
  0x8f   : > { %v427_v16 = vadd.f32 0.5, %v387_v43  ;;  %v428_v9 = vadd.f32 0.5, %v388_v54  ;;  %v875_v3 = vrot.slane %v847_v34, %v1778_v13  ;;  %v499_v7 = vsel %vm491_vm11, 28.22176, %v475_v2 }
  0x90   : > { %v884_v20 = vrot.slane %v876_v6, %v1778_v13  ;;  %634 = vst [vmem:[%s1946_s6] sm:$0x33] %v626_v48  ;;  %v500_v14 = vsel %vm492_vm12, 28.22176, %v476_v27  ;;  %v403_v58 = vsub.f32 %v1914_v40, %v395_v49  ;;  %v404_v50 = vsub.f32 %v1918_v44, %v396_v8  ;;  %v1963_v27 = vld [vmem:[%s1740_s7 + $0x10] sm:$0xff] }
  0x91   : > { %v435_v51 = vmul.f32 8.0, %v427_v16  ;;  %v436_v53 = vmul.f32 8.0, %v428_v9  ;;  %v877_v1 = vcombine.low %v868_v46, %v875_v3  ;;  %v507_v63 = vsel %vm491_vm11, 56.44352, %v483_v39 }
  0x92   : > { %v508_v2 = vsel %vm492_vm12, 56.44352, %v484_v47  ;;  %v341_v56 = vmul.f32 0.00390625, %v1878_v59  ;;  %v411_v40 = vadd.f32 0.5, %v403_v58  ;;  %v412_v44 = vadd.f32 0.5, %v404_v50 }
  0x93   : > { %v524_v15 = vsel %vm513_vm0, %v499_v7, %v507_v63  ;;  %v525_v57 = vsel %vm513_vm0, %v500_v14, %v508_v2  ;;  %v891_v60 = vrot.slane %v877_v1, %v1778_v13  ;;  %v342_v61 = vmul.f32 0.00390625, %v1899_v0 }
  0x94   : > { %v1970_v42 = vcombine.low %v524_v15, %v525_v57  ;;  %v1973_v39 = vfloor.f32 %v341_v56  ;;  %v419_v59 = vmul.f32 8.0, %v411_v40  ;;  %v420_v43 = vmul.f32 8.0, %v412_v44 }
  0x95   : > { %v594_v54 = vmul.f32 1.442695, %v1963_v27  ;;  %v317_v47 = vcvt.s32.f32 %v1799_v23  ;;  %v892_v34 = vcombine.low %v884_v20, %v891_v60  ;;  %v1983_v6 = vfloor.f32 %v342_v61 }
  0x96   : > { %v551_v46 = vmul.f32 %v1970_v42, %v1863_v52  ;;  %v357_v0 = vmul.f32 256.0, %v1973_v39  ;;  %v516_v48 = vsel %vm513_vm0, %v419_v59, %v435_v51  ;;  %v517_v49 = vsel %vm513_vm0, %v420_v43, %v436_v53 }
  0x97   : > { %vm445_vm13 = vcmp.ge.f32.partialorder %v1973_v39, 0.5  ;;  %vm469_vm14 = vcmp.ge.f32.partialorder %v1973_v39, 1.5  ;;  %894 = vst [vmem:[%s288_s10] sm:$0xff] %v892_v34  ;;  %v358_v16 = vmul.f32 256.0, %v1983_v6  ;;  %vm446_vm15 = vcmp.ge.f32.partialorder %v1983_v6, 0.5 }
  0x98   : > { %v559_v52 = vcombine.high %v551_v46, %v551_v46  ;;  %v568_v8 = vadd.f32 %v551_v46, %v516_v48  ;;  %v2000_v9 = vsub.f32 %v314_v21, %v357_v0  ;;  %v453_v3 = vsel %vm445_vm13, 22.4, %v1551_v62 }
  0x99   : > { %v461_v20 = vsel %vm445_vm13, 44.8, %v1551_v62  ;;  %vm470_vm1 = vcmp.ge.f32.partialorder %v1983_v6, 1.5  ;;  %v2008_v58 = vsub.f32 %v315_v22, %v358_v16 }
  0x9a   : > { %v569_v7 = vadd.f32 %v559_v52, %v517_v49  ;;  %v576_v14 = vmax.f32 %v568_v8, 1.0  ;;  %v373_v50 = vadd.f32 0.5, %v2000_v9 }
  0x9b   : > { %1413 = shalt.err (!%p1410_p2)
}
  0x9c   : > { %s1414_s10 = scalar_lea.hbm %s1995_s26, 128  ;;  %s1418_s22 = scalar_lea.hbm %s2265_s3, 256 }
  0x9d   : > { %p1415_p9 = scmp.ne.s32.totalorder %s1995_s26, %s1414_s10  ;;  %p1419_p6 = scmp.lt.u32.totalorder %s1995_s26, %s2265_s3 }
  0x9e   : > { %p1420_p13 = scmp.lt.u32.totalorder %s1418_s22, %s1414_s10  ;;  %p1422_p0 = scmp.lt.u32.totalorder %s1414_s10, %s1995_s26 }
  0x9f   : > { %p1416_p11 = pnand %p1415_p9, %p2280_p5 }
  0xa0   : > { %p1421_p8 = por %p1420_p13, %p1419_p6 }
  0xa1   : > { %p1417_p3 = pneg %p1416_p11 }
  0xa2   : > { %p1423_p7 = por %p1422_p0, %p1421_p8 }
  0xa4   : > { %p1424_p4 = pnand %p1423_p7, %p1417_p3 }
  0xa6   : > { %1427 = shalt.err (!%p1424_p4)
}
  0xa7   : > { %1226 = dma.vmem_to_hbm [thread:$0]  (%p2280_p5), %s1979_s9, 128, %s1995_s26, %s2011_s14   ;;  %v454_v10 = vsel %vm446_vm15, 22.4, %v1551_v62  ;;  %v462_v11 = vsel %vm446_vm15, 44.8, %v1551_v62  ;;  %1336 = vpow2.f32 %v594_v54  ;;  %v577_v22 = vmax.f32 %v569_v7, 1.0 }
  0xa8   : > { %v477_v21 = vsel %vm469_vm14, 40.3168, %v453_v3  ;;  %v584_v51 = vmin.f32 %v576_v14, 128.0  ;;  %v374_v53 = vadd.f32 0.5, %v2008_v58  ;;  %v381_v1 = vmul.f32 0.0625, %v373_v50  ;;  %v2057_v46 = vld [vmem:[%s1740_s7 + $0x18] sm:$0xff] }
  0xa9   : > { %v478_v63 = vsel %vm470_vm1, 40.3168, %v454_v10  ;;  %v485_v2 = vsel %vm469_vm14, 40.3168, %v461_v20  ;;  %v486_v56 = vsel %vm470_vm1, 40.3168, %v462_v11  ;;  %vm700_vm2 = vcmp.eq.f32.partialorder %v1787_v17, %v1835_v28 }
  0xaa   : > { %v585_v40 = vmin.f32 %v577_v22, 128.0  ;;  %v382_v44 = vmul.f32 0.0625, %v374_v53  ;;  %v389_v15 = vfloor.f32 %v381_v1  ;;  %vm493_vm3 = vcmp.ge.f32.partialorder %v1973_v39, 2.5  ;;  %s1218_s7 = sshll.u32 %s1538_s18, 9  ;;  %s972_s9 = sshll.u32 %s1946_s6, 4  ;;  %s2156_s9 = int_to_ptr.vmem [resolvable:$true] %s972_s9 }
  0xab   : > { %vm494_vm4 = vcmp.ge.f32.partialorder %v1983_v6, 2.5  ;;  %v501_v57 = vsel %vm493_vm3, 28.22176, %v477_v21  ;;  %v509_v60 = vsel %vm493_vm3, 56.44352, %v485_v2  ;;  %v335_v61 = vadd.f32 0.5, %v316_v30  ;;  %s2154_s11 = scalar_lea.hbm %s2264_s2, %s1218_s7 }
  0xac   : > { %v627_v59 = vcombine.low %v584_v51, %v585_v40  ;;  %v390_v43 = vfloor.f32 %v382_v44  ;;  %v397_v54 = vmul.f32 16.0, %v389_v15  ;;  %v429_v34 = vadd.f32 0.5, %v389_v15  ;;  %s946_s10 = scalar_lea.sflag [#allocation4], %s1734_s12  ;;  %s1553_s5 = smov [#allocation7]  }
  0xad   : > { %v502_v0 = vsel %vm494_vm4, 28.22176, %v478_v63  ;;  %v510_v48 = vsel %vm494_vm4, 56.44352, %v486_v56  ;;  %v526_v49 = vsel %vm513_vm0, %v501_v57, %v509_v60  ;;  %v336_v39 = vadd.f32 0.5, %v317_v47  ;;  %s1432_s21 = sshll.u32 %s1553_s5, 4  ;;  %s1433_s21 = int_to_ptr.vmem [resolvable:$false] %s1432_s21 }
  0xae   : > { %635 = vst [vmem:[%s1946_s6 + $0x8] sm:$0x33] %v627_v59  ;;  %v398_v6 = vmul.f32 16.0, %v390_v43  ;;  %v405_v52 = vsub.f32 %v2000_v9, %v397_v54  ;;  %v430_v8 = vadd.f32 0.5, %v390_v43  ;;  %v437_v16 = vmul.f32 8.0, %v429_v34  ;;  %s1434_s22 = scalar_lea.vmem %s1433_s21, 1024  ;;  %p1435_p2 = scmp.lt.s32.totalorder %s2156_s9, %s1433_s21 }
  0xaf   : > { %v527_v3 = vsel %vm513_vm0, %v502_v0, %v510_v48  ;;  %v343_v20 = vmul.f32 0.00390625, %v335_v61  ;;  %v344_v7 = vmul.f32 0.00390625, %v336_v39  ;;  %v596_v14 = vmul.f32 1.442695, %v2057_v46 }
  0xb0   : > { %v406_v50 = vsub.f32 %v2008_v58, %v398_v6  ;;  %v413_v10 = vadd.f32 0.5, %v405_v52  ;;  %v438_v11 = vmul.f32 8.0, %v430_v8  ;;  %v2067_v21 = vcombine.low %v526_v49, %v527_v3 }
  0xb1   : > { %v2069_v22 = vpop.eup %1336  ;;  %v351_v51 = vfloor.f32 %v343_v20  ;;  %v352_v53 = vfloor.f32 %v344_v7  ;;  %1338 = vpow2.f32 %v596_v14  ;;  %v598_v9 = vrot.slane %v1890_v55, 6 }
  0xb2   : > { %v414_v1 = vadd.f32 0.5, %v406_v50  ;;  %v421_v63 = vmul.f32 8.0, %v413_v10  ;;  %v552_v2 = vmul.f32 %v2067_v21, %v1963_v27  ;;  %v599_v56 = vrot.slane %v1970_v42, 6 }
  0xb3   : > { %v359_v40 = vmul.f32 256.0, %v351_v51  ;;  %v360_v58 = vmul.f32 256.0, %v352_v53  ;;  %vm447_vm5 = vcmp.ge.f32.partialorder %v351_v51, 0.5  ;;  %vm448_vm6 = vcmp.ge.f32.partialorder %v352_v53, 0.5 }
  0xb4   : > { %v422_v44 = vmul.f32 8.0, %v414_v1  ;;  %v518_v15 = vsel %vm513_vm0, %v421_v63, %v437_v16  ;;  %v560_v57 = vcombine.high %v552_v2, %v552_v2  ;;  %v455_v60 = vsel %vm447_vm5, 22.4, %v1551_v62 }
  0xb5   : > { %v570_v61 = vadd.f32 %v552_v2, %v518_v15  ;;  %v367_v55 = vsub.f32 %v316_v30, %v359_v40  ;;  %v368_v59 = vsub.f32 %v317_v47, %v360_v58  ;;  %v456_v27 = vsel %vm448_vm6, 22.4, %v1551_v62 }
  0xb6   : > { %v519_v42 = vsel %vm513_vm0, %v422_v44, %v438_v11  ;;  %v463_v43 = vsel %vm447_vm5, 44.8, %v1551_v62  ;;  %v464_v54 = vsel %vm448_vm6, 44.8, %v1551_v62  ;;  %vm471_vm7 = vcmp.ge.f32.partialorder %v351_v51, 1.5 }
  0xb7   : > { %v571_v34 = vadd.f32 %v560_v57, %v519_v42  ;;  %v578_v0 = vmax.f32 %v570_v61, 1.0  ;;  %v375_v48 = vadd.f32 0.5, %v367_v55  ;;  %v376_v49 = vadd.f32 0.5, %v368_v59 }
  0xb8   : > { %vm472_vm8 = vcmp.ge.f32.partialorder %v352_v53, 1.5  ;;  %v479_v39 = vsel %vm471_vm7, 40.3168, %v455_v60  ;;  %v487_v12 = vsel %vm471_vm7, 40.3168, %v463_v43  ;;  %vm495_vm9 = vcmp.ge.f32.partialorder %v351_v51, 2.5 }
  0xb9   : > { %v579_v30 = vmax.f32 %v571_v34, 1.0  ;;  %v586_v23 = vmin.f32 %v578_v0, 128.0  ;;  %v383_v47 = vmul.f32 0.0625, %v375_v48  ;;  %v384_v6 = vmul.f32 0.0625, %v376_v49 }
  0xba   : > { %v480_v52 = vsel %vm472_vm8, 40.3168, %v456_v27  ;;  %v488_v8 = vsel %vm472_vm8, 40.3168, %v464_v54  ;;  %vm496_vm10 = vcmp.ge.f32.partialorder %v352_v53, 2.5  ;;  %v606_v16 = vmul.f32 %v1901_v5, %v598_v9 }
  0xbb   : > { %v1339_v3 = vpop.eup %1338  ;;  %v587_v62 = vmin.f32 %v579_v30, 128.0  ;;  %v391_v20 = vfloor.f32 %v383_v47  ;;  %v392_v7 = vfloor.f32 %v384_v6  ;;  %v503_v14 = vsel %vm495_vm9, 28.22176, %v479_v39 }
  0xbc   : > { %v504_v50 = vsel %vm496_vm10, 28.22176, %v480_v52  ;;  %v511_v10 = vsel %vm495_vm9, 56.44352, %v487_v12  ;;  %v512_v11 = vsel %vm496_vm10, 56.44352, %v488_v8  ;;  %v607_v51 = vmul.f32 %v1953_v36, %v599_v56 }
  0xbd   : > { %v628_v1 = vcombine.low %v586_v23, %v587_v62  ;;  %v399_v63 = vmul.f32 16.0, %v391_v20  ;;  %v400_v2 = vmul.f32 16.0, %v392_v7  ;;  %v431_v40 = vadd.f32 0.5, %v391_v20 }
  0xbe   : > { %v432_v58 = vadd.f32 0.5, %v392_v7  ;;  %v528_v53 = vsel %vm513_vm0, %v503_v14, %v511_v10  ;;  %v529_v5 = vsel %vm513_vm0, %v504_v50, %v512_v11  ;;  %v610_v9 = vmax.f32 %v606_v16, 1.0 }
  0xbf   : > { %636 = vst [vmem:[%s1946_s6 + $0x10] sm:$0x33] %v628_v1  ;;  %v407_v44 = vsub.f32 %v367_v55, %v399_v63  ;;  %v408_v15 = vsub.f32 %v368_v59, %v400_v2  ;;  %v439_v57 = vmul.f32 8.0, %v431_v40  ;;  %v545_v60 = vcombine.low %v528_v53, %v529_v5 }
  0xc0   : > { %v440_v61 = vmul.f32 8.0, %v432_v58  ;;  %v614_v27 = vmin.f32 %v610_v9, 128.0  ;;  %v611_v36 = vmax.f32 %v607_v51, 1.0  ;;  %v600_v56 = vrot.slane %v2067_v21, 6 }
  0xc1   : > { %v415_v42 = vadd.f32 0.5, %v407_v44  ;;  %v416_v43 = vadd.f32 0.5, %v408_v15  ;;  %v553_v54 = vmul.f32 %v545_v60, %v2057_v46  ;;  %v601_v34 = vrot.slane %v545_v60, 6 }
  0xc2   : > { %638 = vst [vmem:[%s1946_s6] sm:$0xcc] %v614_v27  ;;  %v615_v0 = vmin.f32 %v611_v36, 128.0  ;;  %v608_v48 = vmul.f32 %v2069_v22, %v600_v56  ;;  %vm701_vm11 = vcmp.eq.f32.partialorder %v1790_v18, %v1837_v29  ;;  %vm702_vm12 = vcmp.eq.f32.partialorder %v1793_v19, %v1839_v33 }
  0xc3   : > { %v423_v55 = vmul.f32 8.0, %v415_v42  ;;  %v424_v59 = vmul.f32 8.0, %v416_v43  ;;  %v561_v49 = vcombine.high %v553_v54, %v553_v54  ;;  %v609_v39 = vmul.f32 %v1339_v3, %v601_v34 }
  0xc4   : > { %639 = vst [vmem:[%s1946_s6 + $0x8] sm:$0xcc] %v615_v0  ;;  %v612_v21 = vmax.f32 %v608_v48, 1.0  ;;  %vm703_vm13 = vcmp.eq.f32.partialorder %v1802_v24, %v1841_v35  ;;  %vm704_vm14 = vcmp.eq.f32.partialorder %v1805_v25, %v1843_v37  ;;  %vm705_vm15 = vcmp.eq.f32.partialorder %v1808_v26, %v1845_v38 }
  0xc5   : > { %v520_v46 = vsel %vm513_vm0, %v423_v55, %v439_v57  ;;  %v521_v22 = vsel %vm513_vm0, %v424_v59, %v440_v61  ;;  %v613_v12 = vmax.f32 %v609_v39, 1.0  ;;  %vm706_vm1 = vcmp.eq.f32.partialorder %v1815_v31, %v1850_v41 }
  0xc6   : > { %v572_v30 = vadd.f32 %v553_v54, %v520_v46  ;;  %v573_v23 = vadd.f32 %v561_v49, %v521_v22  ;;  %v616_v47 = vmin.f32 %v612_v21, 128.0  ;;  %vm707_vm3 = vcmp.eq.f32.partialorder %v1818_v32, %v1855_v45 }
  0xc7   : > { %v617_v6 = vmin.f32 %v613_v12, 128.0  ;;  %v708_v52 = vsel %vm700_vm2, %v1756_v4, 8  ;;  %v709_v8 = vsel %vm701_vm11, %v1756_v4, 8  ;;  %v710_v16 = vsel %vm702_vm12, %v1756_v4, 8 }
  0xc8   : > { %v580_v3 = vmax.f32 %v572_v30, 1.0  ;;  %v581_v62 = vmax.f32 %v573_v23, 1.0  ;;  %640 = vst [vmem:[%s1946_s6 + $0x10] sm:$0xcc] %v616_v47  ;;  %v711_v32 = vsel %vm703_vm13, %v1756_v4, 8  ;;  %v712_v17 = vsel %vm704_vm14, %v1756_v4, 8 }
  0xc9   : > { %641 = vst [vmem:[%s1946_s6 + $0x18] sm:$0xcc] %v617_v6  ;;  %v2137_v18 = vsel %vm705_vm15, %v1756_v4, 8  ;;  %v2143_v19 = vsel %vm706_vm1, %v1756_v4, 8  ;;  %v2146_v24 = vsel %vm707_vm3, %v1756_v4, 8  ;;  %v716_v28 = vrot.slane %v708_v52, 4 }
  0xca   : > { %v588_v25 = vmin.f32 %v580_v3, 128.0  ;;  %v589_v29 = vmin.f32 %v581_v62, 128.0  ;;  %v725_v33 = vrot.slane %v709_v8, 4  ;;  %v734_v35 = vrot.slane %v710_v16, 4 }
  0xcb   : > { %vm717_vm0 = vcmp.lt.s32.totalorder %v708_v52, %v716_v28  ;;  %v743_v26 = vrot.slane %v711_v32, 4  ;;  %v752_v37 = vrot.slane %v712_v17, 4  ;;  %v761_v38 = vrot.slane %v2137_v18, 4 }
  0xcc   : > { %v629_v45 = vcombine.low %v588_v25, %v589_v29  ;;  %v718_v31 = vsel %vm717_vm0, %v708_v52, %v716_v28  ;;  %vm726_vm2 = vcmp.lt.s32.totalorder %v709_v8, %v725_v33  ;;  %vm735_vm4 = vcmp.lt.s32.totalorder %v710_v16, %v734_v35 }
  0xcd   : > { %v719_v4 = vrot.slane %v718_v31, 2  ;;  %v727_v41 = vsel %vm726_vm2, %v709_v8, %v725_v33  ;;  %v736_v20 = vsel %vm735_vm4, %v710_v16, %v734_v35  ;;  %vm744_vm5 = vcmp.lt.s32.totalorder %v711_v32, %v743_v26 }
  0xce   : > { %637 = vst [vmem:[%s1946_s6 + $0x18] sm:$0x33] %v629_v45  ;;  %v728_v7 = vrot.slane %v727_v41, 2  ;;  %v737_v14 = vrot.slane %v736_v20, 2  ;;  %v745_v50 = vsel %vm744_vm5, %v711_v32, %v743_v26  ;;  %vm753_vm6 = vcmp.lt.s32.totalorder %v712_v17, %v752_v37  ;;  %s1428_s6 = scalar_lea.vmem %s2156_s9, 512 }
  0xcf   : > { %vm2159_vm7 = vcmp.lt.s32.totalorder %v718_v31, %v719_v4  ;;  %v746_v11 = vrot.slane %v745_v50, 2  ;;  %v754_v51 = vsel %vm753_vm6, %v712_v17, %v752_v37  ;;  %vm2166_vm8 = vcmp.lt.s32.totalorder %v2137_v18, %v761_v38  ;;  %p1429_p10 = scmp.ne.s32.totalorder %s2156_s9, %s1428_s6  ;;  %p1436_p9 = scmp.lt.s32.totalorder %s1434_s22, %s1428_s6 }
  0xd1   : > { %p1430_p12 = pnand %p1429_p10, %p2280_p5  ;;  %p1437_p11 = por %p1436_p9, %p1435_p2 }
  0xd3   : > { %p1431_p1 = pneg %p1430_p12 }
  0xd5   : > { %p1438_p3 = pnand %p1437_p11, %p1431_p1 }
  0xd7   : > { %1441 = shalt.err (!%p1438_p3)
}
  0xd8   : > { %s1442_s13 = scalar_lea.hbm %s2154_s11, 512  ;;  %s1446_s26 = scalar_lea.hbm %s2264_s2, 1024 }
  0xd9   : > { %p1443_p6 = scmp.ne.s32.totalorder %s2154_s11, %s1442_s13  ;;  %p1447_p0 = scmp.lt.u32.totalorder %s2154_s11, %s2264_s2 }
  0xda   : > { %p1448_p7 = scmp.lt.u32.totalorder %s1446_s26, %s1442_s13  ;;  %p1450_p10 = scmp.lt.u32.totalorder %s1442_s13, %s2154_s11 }
  0xdb   : > { %p1444_p13 = pnand %p1443_p6, %p2280_p5 }
  0xdc   : > { %p1449_p4 = por %p1448_p7, %p1447_p0 }
  0xdd   : > { %p1445_p8 = pneg %p1444_p13 }
  0xde   : > { %p1451_p12 = por %p1450_p10, %p1449_p4 }
  0xe0   : > { %p1452_p1 = pnand %p1451_p12, %p1445_p8 }
  0xe2   : > { %1455 = shalt.err (!%p1452_p1)
}
  0xe3   : > { %1225 = dma.vmem_to_hbm [thread:$0]  (%p2280_p5), %s2156_s9, 512, %s2154_s11, %s946_s10   ;;  %v721_v63 = vsel %vm2159_vm7, %v718_v31, %v719_v4  ;;  %vm729_vm9 = vcmp.lt.s32.totalorder %v727_v41, %v728_v7  ;;  %vm738_vm10 = vcmp.lt.s32.totalorder %v736_v20, %v737_v14  ;;  %v755_v2 = vrot.slane %v754_v51, 2 }
  0xe4   : > { %v722_v40 = vrot.slane %v721_v63, 1  ;;  %v730_v58 = vsel %vm729_vm9, %v727_v41, %v728_v7  ;;  %v739_v53 = vsel %vm738_vm10, %v736_v20, %v737_v14  ;;  %vm747_vm11 = vcmp.lt.s32.totalorder %v745_v50, %v746_v11  ;;  %s295_s9 = scalar_lea.vmem [#allocation10], %s1195_s27  ;;  %s1002_s21 = scalar_lea.hbm %s2266_s4, %s1219_s25 }
  0xe5   : > { %v731_v5 = vrot.slane %v730_v58, 1  ;;  %v740_v9 = vrot.slane %v739_v53, 1  ;;  %v748_v44 = vsel %vm747_vm11, %v745_v50, %v746_v11  ;;  %vm756_vm12 = vcmp.lt.s32.totalorder %v754_v51, %v755_v2  ;;  %s1004_s11 = sshll.u32 %s295_s9, 4  ;;  %s1554_s12 = smov [#allocation10]   ;;  %s2213_s11 = int_to_ptr.vmem [resolvable:$true] %s1004_s11 }
  0xe6   : > { %vm723_vm13 = vcmp.lt.s32.totalorder %v721_v63, %v722_v40  ;;  %v749_v15 = vrot.slane %v748_v44, 1  ;;  %v757_v57 = vsel %vm756_vm12, %v754_v51, %v755_v2  ;;  %v763_v60 = vsel %vm2166_vm8, %v2137_v18, %v761_v38  ;;  %s1456_s22 = scalar_lea.vmem %s2213_s11, 128  ;;  %s1460_s27 = sshll.u32 %s1554_s12, 4  ;;  %s1461_s27 = int_to_ptr.vmem [resolvable:$false] %s1460_s27 }
  0xe7   : > { %vm732_vm14 = vcmp.lt.s32.totalorder %v730_v58, %v731_v5  ;;  %vm741_vm15 = vcmp.lt.s32.totalorder %v739_v53, %v740_v9  ;;  %v758_v61 = vrot.slane %v757_v57, 1  ;;  %v764_v27 = vrot.slane %v763_v60, 2  ;;  %p1457_p2 = scmp.ne.s32.totalorder %s2213_s11, %s1456_s22  ;;  %s1462_s13 = scalar_lea.vmem %s1461_s27, 256 }
  0xe8   : > { %vm750_vm1 = vcmp.lt.s32.totalorder %v748_v44, %v749_v15  ;;  %v724_v36 = vsel %vm723_vm13, %v721_v63, %v722_v40  ;;  %v733_v56 = vsel %vm732_vm14, %v730_v58, %v731_v5  ;;  %v770_v42 = vrot.slane %v2143_v19, 4  ;;  %p1463_p3 = scmp.lt.s32.totalorder %s2213_s11, %s1461_s27  ;;  %p1464_p6 = scmp.lt.s32.totalorder %s1462_s13, %s1456_s22 }
  0xe9   : > { %v779_v43 = vrot.slane %v2146_v24, 4  ;;  %v742_v54 = vsel %vm741_vm15, %v739_v53, %v740_v9  ;;  %v751_v34 = vsel %vm750_vm1, %v748_v44, %v749_v15  ;;  %vm765_vm3 = vcmp.lt.s32.totalorder %v763_v60, %v764_v27  ;;  %p1458_p9 = pnand %p1457_p2, %p2280_p5 }
  0xea   : > { %vm759_vm0 = vcmp.lt.s32.totalorder %v757_v57, %v758_v61  ;;  %v766_v0 = vsel %vm765_vm3, %v763_v60, %v764_v27  ;;  %vm771_vm2 = vcmp.lt.s32.totalorder %v2143_v19, %v770_v42  ;;  %v895_v49 = vcombine.low %v724_v36, %v733_v56  ;;  %p1465_p13 = por %p1464_p6, %p1463_p3 }
  0xeb   : > { %vm780_vm4 = vcmp.lt.s32.totalorder %v2146_v24, %v779_v43  ;;  %v767_v48 = vrot.slane %v766_v0, 1  ;;  %v772_v55 = vsel %vm771_vm2, %v2143_v19, %v770_v42  ;;  %v896_v46 = vcombine.low %v742_v54, %v751_v34  ;;  %p1459_p11 = pneg %p1458_p9 }
  0xec   : > { %v781_v59 = vsel %vm780_vm4, %v2146_v24, %v779_v43  ;;  %v773_v39 = vrot.slane %v772_v55, 2  ;;  %v760_v22 = vsel %vm759_vm0, %v757_v57, %v758_v61  ;;  %v905_v47 = vrot.slane %v895_v49, %v1778_v13 }
  0xed   : > { %v782_v21 = vrot.slane %v781_v59, 2  ;;  %vm768_vm5 = vcmp.lt.s32.totalorder %v766_v0, %v767_v48  ;;  %v912_v16 = vrot.slane %v896_v46, %v1778_v13  ;;  %p1466_p8 = pnand %p1465_p13, %p1459_p11 }
  0xee   : > { %v769_v12 = vsel %vm768_vm5, %v766_v0, %v767_v48  ;;  %vm774_vm6 = vcmp.lt.s32.totalorder %v772_v55, %v773_v39 }
  0xef   : > { %vm783_vm7 = vcmp.lt.s32.totalorder %v781_v59, %v782_v21  ;;  %v775_v30 = vsel %vm774_vm6, %v772_v55, %v773_v39  ;;  %v897_v8 = vcombine.low %v760_v22, %v769_v12  ;;  %v927_v18 = vcombine.low %v905_v47, %v912_v16 }
  0xf0   : > { %v784_v23 = vsel %vm783_vm7, %v781_v59, %v782_v21  ;;  %v776_v6 = vrot.slane %v775_v30, 1 }
  0xf1   : > { %v785_v52 = vrot.slane %v784_v23, 1  ;;  %v919_v17 = vrot.slane %v897_v8, %v1778_v13  ;;  %v935_v28 = vrot.slane %v927_v18, %v1778_v13 }
  0xf2   : > { %vm777_vm8 = vcmp.lt.s32.totalorder %v775_v30, %v776_v6 }
  0xf3   : > { %vm786_vm9 = vcmp.lt.s32.totalorder %v784_v23, %v785_v52  ;;  %v778_v3 = vsel %vm777_vm8, %v775_v30, %v776_v6 }
  0xf4   : > { %v787_v62 = vsel %vm786_vm9, %v784_v23, %v785_v52 }
  0xf5   : > { %v898_v32 = vcombine.low %v778_v3, %v787_v62 }
  0xf7   : > { %v926_v19 = vrot.slane %v898_v32, %v1778_v13 }
  0xf9   : > { %v928_v24 = vcombine.low %v919_v17, %v926_v19 }
  0xfb   : > { %v942_v25 = vrot.slane %v928_v24, %v1778_v13 }
  0xfd   : > { %v943_v29 = vcombine.low %v935_v28, %v942_v25 }
  0xff   : > { %944 = vst [vmem:[%s295_s9] sm:$0xff] %v943_v29 }
 0x100   : > { %1469 = shalt.err (!%p1466_p8)
}
 0x101   : > { %s1470_s18 = scalar_lea.hbm %s1002_s21, 128  ;;  %s1474_s7 = scalar_lea.hbm %s2266_s4, 256 }
 0x102   : > { %p1471_p0 = scmp.ne.s32.totalorder %s1002_s21, %s1470_s18  ;;  %p1475_p10 = scmp.lt.u32.totalorder %s1002_s21, %s2266_s4 }
 0x103   : > { %p1476_p12 = scmp.lt.u32.totalorder %s1474_s7, %s1470_s18  ;;  %p1478_p2 = scmp.lt.u32.totalorder %s1470_s18, %s1002_s21 }
 0x104   : > { %p1472_p7 = pnand %p1471_p0, %p2280_p5 }
 0x105   : > { %p1477_p1 = por %p1476_p12, %p1475_p10 }
 0x106   : > { %p1473_p4 = pneg %p1472_p7 }
 0x107   : > { %p1479_p9 = por %p1478_p2, %p1477_p1 }
 0x109   : > { %p1480_p11 = pnand %p1479_p9, %p1473_p4 }
 0x10b   : > { %1483 = shalt.err (!%p1480_p11)
}
 0x10c   : > { %1227 = dma.vmem_to_hbm [thread:$0]  (%p2280_p5), %s2213_s11, 128, %s1002_s21, %s2011_s14  }
 0x10d PF: > { %s1016_s5 = sand.u32 1, %s1526_s15   ;;  %p2285_p3 = scmp.ne.s32.totalorder %s2273_s30, 0 }
 0x10e   : > { %p2286_p6 = scmp.ge.s32.totalorder %s1546_s20, 2  ;;  %s1017_s9 = scalar_lea.sflag [#allocation4], %s1016_s5 }
 0x110   : > { %p1239_p13 = pnand %p2286_p6, %p2285_p3 }
 0x112   : > { %1517 = dma.done.wait (!%p1239_p13), %s1017_s9, 512  }
 0x113   : > { %1519 = vsyncadd (!%p1239_p13), %s1017_s9, 4294966784  ;;  %s2287_s10 = sadd.s32 4294967294, %s1546_s20  }
 0x114   : > { %s1025_s6 = sand.u32 1, %s2287_s10  }
 0x115   : > { %s1026_s22 = scalar_lea.sflag [#allocation9], %s1025_s6 }
 0x116   : > { %1521 = dma.done.wait (!%p1239_p13), %s1026_s22, 256  }
 0x117   : > { %1523 = vsyncadd (!%p1239_p13), %s1026_s22, 4294967040  ;;  %s27_s20 = sadd.s32 1, %s1546_s20   ;;  %s2288_s15 = smov %s1530_s16 }
 0x118   : > { %p24_p5 = scmp.ge.s32.totalorder %s27_s20, 4   ;;  %s2289_s16 = smov %s1534_s17 }
 0x119   : > { %s2290_s17 = smov %s1642_s29  ;;  %s2291_s18 = smov %s1542_s19 }
 0x11a   : > { %s2292_s19 = smov %s2294_s23  ;;  %26 = sbr.rel (!%p24_p5) target bundleno = 10 (0xa), region = 118 }
 0x121   :  { %1040 = vsyncpa [#allocation3], 1 }
 0x122   :  { %1042 = vsyncpa [#allocation3 + $0x1], 1 }
 0x123   :  { %1043 = vsyncpa [#allocation6], 1 }
 0x124   :  { %1045 = vsyncpa [#allocation6 + $0x1], 1 }
 0x125   :  { %1046 = vsyncpa [#allocation4], 1 }
 0x126   :  { %1048 = vsyncpa [#allocation4 + $0x1], 1 }
 0x127   :  { %1049 = vsyncpa [#allocation9], 1 }
 0x128   :  { %1051 = vsyncpa [#allocation9 + $0x1], 1 }

</bundles_post_ra>
